<compile_context>
chip_gen: v7x
topology: tpu7x:2x2x1
jax: 0.10.0
libtpu: 0.0.40
codegen_flags: <defaults>
</compile_context>

<pallas_src>
import jax
import jax.numpy as jnp
from jax.experimental import pallas as pl
from jax.experimental.pallas import tpu as pltpu


def _ms_kernel(p_ref, q_ref, x_ref, y_ref):
    """p/q: (R, 1) pair-broadcast folded gains.  x/y: (R, C) row-interleaved
    stereo slab [L_0, R_0, L_1, R_1, ...] along the sublane axis.

      y[2b]   = a_b * x[2b]   + b_b * x[2b+1]   (new left)
      y[2b+1] = a_b * x[2b+1] + b_b * x[2b]     (new right)
    """
    x = x_ref[...]
    rows = x.shape[0]
    # partner(x)[r] = x[r ^ 1]: two sublane shifts + parity select.
    # (pltpu.roll(x, -+1, axis=0) would also work; explicit slices keep the
    # shift direction unambiguous.)  The circular-wrap rows are never selected,
    # and stale rows of partial batch blocks never reach valid output rows.
    nxt = jnp.concatenate([x[1:], x[:1]], axis=0)      # nxt[r] = x[r+1]
    prv = jnp.concatenate([x[-1:], x[:-1]], axis=0)    # prv[r] = x[r-1]
    parity = jax.lax.broadcasted_iota(jnp.int32, (rows, 1), 0) % 2
    partner = jnp.where(parity == 0, nxt, prv)
    y_ref[...] = (p_ref[...] * x + q_ref[...] * partner).astype(y_ref.dtype)


def _vmem_budget():
    """Generation-aware (scoped VMEM limit, per-block byte target)."""
    cap = 64 << 20
    try:
        cap = int(getattr(pltpu.get_tpu_info(), "vmem_capacity_bytes", cap))
    except Exception:
        pass
    if cap >= (100 << 20):            # v5e / v6e: 128 MiB physical VMEM
        return 64 << 20, 8 << 20      # (scoped limit, ~8 MiB blocks)
    return 32 << 20, 5 << 20          # v7x (64 MiB physical) or unknown


def _choose_tiles(rows, cols, itemsize, target_bytes):
    """Pick (block_rows, block_cols) for the dense [2B, T] slab.

    block_rows is a multiple of 8 (or the full row count), block_cols a
    multiple of 128 (or the full T).  Partial edge blocks are left to Pallas'
    masking, so nothing is ever padded or copied in HBM.
    """
    total = rows * cols * itemsize
    if total >= (2 << 20):
        # Guarantee >= 2 grid steps for any non-trivial size: keeps DMA-in /
        # compute / DMA-out pipelined and gives both v7x TensorCores work.
        target_bytes = min(target_bytes, total // 2)
    row_bytes = cols * itemsize
    if rows * row_bytes <= target_bytes:
        return rows, cols                               # single full block
    rows_fit = target_bytes // row_bytes
    if rows_fit >= 8:
        return min(rows, (rows_fit // 8) * 8), cols     # tile batch only
    # Even an 8-row full-T slab is too big -> tile the sample axis too
    # (long-audio case; removes the old VMEM-assert availability gap).
    tbr = rows if rows <= 8 else 8
    tc = max(128, (target_bytes // (tbr * itemsize)) // 128 * 128)
    return tbr, min(tc, cols)


def mid_side_proc(x, gain_mid, gain_side, mult: float = 0.5, *,
                  block_rows=None, block_cols=None):
    """x: [B, 2, T]; gain_mid / gain_side: per-batch scalar gains ([B] or [B,1]).

    Matches MidSideProc.forward with `proc` instantiated as a per-batch
    scalar gain.  Returns [B, 2, T] in x.dtype.
    """
    B, C, T = x.shape
    assert C == 2, "MidSideProc expects a stereo input [B, 2, T]"
    dtype = x.dtype
    itemsize = jnp.dtype(dtype).itemsize

    # Fold all scalar work into two per-batch coefficients (wrapper, O(B)).
    mult_sq = float(mult) * float(mult)
    gm = jnp.reshape(gain_mid, (B,)).astype(jnp.float32)
    gs = jnp.reshape(gain_side, (B,)).astype(jnp.float32)
    a = mult_sq * (gm + gs)          # L' = a*L + b*R
    b = mult_sq * (gm - gs)          # R' = b*L + a*R
    # Row-interleaved, pair-broadcast coefficients for the [2B, T] view.
    p = jnp.repeat(a, 2)[:, None].astype(dtype)        # (2B, 1)
    q = jnp.repeat(b, 2)[:, None].astype(dtype)        # (2B, 1)

    # Free (contiguous) view: [B, 2, T] -> [2B, T]; rows 2b / 2b+1 are L_b / R_b.
    rows = 2 * B
    x2 = jnp.reshape(x, (rows, T))

    vmem_limit, target = _vmem_budget()
    tbr, tc = _choose_tiles(rows, T, itemsize, target)
    if block_rows is not None:
        tbr = int(block_rows)
    if block_cols is not None:
        tc = int(block_cols)
    if tbr != rows and (tbr % 8 != 0 or tbr % 2 != 0):
        raise ValueError("block_rows must cover full L/R pairs and be a multiple of 8")
    if tc != T and tc % 128 != 0:
        raise ValueError("block_cols must be a multiple of 128 (or the full T)")

    grid = (pl.cdiv(rows, tbr), pl.cdiv(T, tc))   # partial edge blocks are masked

    y2 = pl.pallas_call(
        _ms_kernel,
        out_shape=jax.ShapeDtypeStruct((rows, T), dtype),
        grid=grid,
        in_specs=[
            pl.BlockSpec((tbr, 1), lambda i, j: (i, 0)),    # p (resident over j)
            pl.BlockSpec((tbr, 1), lambda i, j: (i, 0)),    # q (resident over j)
            pl.BlockSpec((tbr, tc), lambda i, j: (i, j)),   # x slab
        ],
        out_specs=pl.BlockSpec((tbr, tc), lambda i, j: (i, j)),
        compiler_params=pltpu.CompilerParams(
            dimension_semantics=("parallel", "parallel"),
            vmem_limit_bytes=vmem_limit,
        ),
    )(p, q, x2)

    return jnp.reshape(y2, (B, 2, T))              # free view back to [B, 2, T]


def mid_side_proc_ref(x, gain_mid, gain_side, mult: float = 0.5):
    """Pure-JAX reference mirroring the PyTorch forward exactly (f32 math)."""
    B = x.shape[0]
    gm = jnp.reshape(gain_mid, (B, 1, 1)).astype(jnp.float32)
    gs = jnp.reshape(gain_side, (B, 1, 1)).astype(jnp.float32)
    xf = x.astype(jnp.float32)
    left, right = xf[:, 0:1, :], xf[:, 1:2, :]
    mid = (left + right) * mult
    side = (left - right) * mult
    mid = mid * gm                      # inner proc: per-batch scalar gain
    side = side * gs
    y = jnp.concatenate([mid + side, mid - side], axis=-2)
    return y * mult


if __name__ == "__main__":
    key = jax.random.PRNGKey(0)
    ks = jax.random.split(key, 9)

    # Case 1: small, aligned shapes (single-block fast path).
    B, T = 4, 1024
    x = jax.random.normal(ks[0], (B, 2, T), dtype=jnp.float32)
    gm = jax.nn.sigmoid(jax.random.normal(ks[1], (B, 1), dtype=jnp.float32))
    gs = jax.nn.sigmoid(jax.random.normal(ks[2], (B, 1), dtype=jnp.float32))
    y = jax.block_until_ready(mid_side_proc(x, gm, gs, mult=0.5))
    y_ref = mid_side_proc_ref(x, gm, gs, mult=0.5)
    assert y.shape == x.shape and y.dtype == x.dtype
    assert jnp.allclose(y, y_ref, atol=1e-5, rtol=1e-5), "mismatch vs reference (case 1)"

    # Case 2: odd batch, unaligned T, forced tiling -> multi-step (2,4) grid
    # with masked partial blocks on both axes (no padding, no output slicing).
    B2, T2 = 5, 1000
    x_b = jax.random.normal(ks[3], (B2, 2, T2), dtype=jnp.float32)
    gm_b = jax.nn.sigmoid(jax.random.normal(ks[4], (B2, 1), dtype=jnp.float32))
    gs_b = jax.nn.sigmoid(jax.random.normal(ks[5], (B2, 1), dtype=jnp.float32))
    y_b = jax.block_until_ready(
        mid_side_proc(x_b, gm_b, gs_b, mult=0.5, block_rows=8, block_cols=256))
    y_b_ref = mid_side_proc_ref(x_b, gm_b, gs_b, mult=0.5)
    assert y_b.shape == x_b.shape and y_b.dtype == x_b.dtype
    assert jnp.allclose(y_b, y_b_ref, atol=1e-5, rtol=1e-5), "mismatch vs reference (case 2)"

    # Case 3: bf16 stream, mixed natively in bf16 (no f32 round-trip in-kernel).
    B3, T3 = 6, 512
    x3 = jax.random.normal(ks[6], (B3, 2, T3), dtype=jnp.float32)
    gm3 = jax.nn.sigmoid(jax.random.normal(ks[7], (B3, 1), dtype=jnp.float32))
    gs3 = jax.nn.sigmoid(jax.random.normal(ks[8], (B3, 1), dtype=jnp.float32))
    y3 = jax.block_until_ready(
        mid_side_proc(x3.astype(jnp.bfloat16), gm3, gs3, mult=0.5))
    y3_ref = mid_side_proc_ref(x3, gm3, gs3, mult=0.5)
    assert y3.shape == (B3, 2, T3) and y3.dtype == jnp.bfloat16
    assert jnp.allclose(y3.astype(jnp.float32), y3_ref, atol=5e-2, rtol=5e-2), \
        "mismatch vs reference (case 3, bf16)"

    # TODO(synk): generic `proc` submodules (e.g. IIR/EQ DSP processors) would
    # need their own kernels; only the per-batch scalar-gain instantiation of
    # `proc` is fused here.
    print("KERNEL_OK")
</pallas_src>

<mosaic_0001>
module attributes {stable_mosaic.version = 11 : i64} {
  func.func @_ms_kernel(%arg0: i32, %arg1: i32, %arg2: memref<8x1xf32, #tpu.memory_space<vmem>>, %arg3: memref<8x1xf32, #tpu.memory_space<vmem>>, %arg4: memref<8x1024xf32, #tpu.memory_space<vmem>>, %arg5: memref<8x1024xf32, #tpu.memory_space<vmem>>) attributes {dimension_semantics = [#tpu.dimension_semantics<parallel>, #tpu.dimension_semantics<parallel>], iteration_bounds = array<i64: 1, 1>, scalar_prefetch = 0 : i64, scratch_operands = 0 : i64, tpu.core_type = #tpu.core_type<tc>, window_params = [{transform_indices = @transform_0, window_bounds = array<i64: 8, 1>}, {transform_indices = @transform_1, window_bounds = array<i64: 8, 1>}, {transform_indices = @transform_2, window_bounds = array<i64: 8, 1024>}, {transform_indices = @transform_3, window_bounds = array<i64: 8, 1024>}]} {
    %c0 = arith.constant 0 : index
    %c0_0 = arith.constant 0 : index
    %0 = vector.load %arg4[%c0, %c0_0] : memref<8x1024xf32, #tpu.memory_space<vmem>>, vector<8x1024xf32>
    %1 = vector.extract_strided_slice %0 {offsets = [1, 0], sizes = [7, 1024], strides = [1, 1]} : vector<8x1024xf32> to vector<7x1024xf32>
    %2 = vector.extract_strided_slice %0 {offsets = [0, 0], sizes = [1, 1024], strides = [1, 1]} : vector<8x1024xf32> to vector<1x1024xf32>
    %3 = tpu.concatenate %1, %2 in 0 : vector<7x1024xf32>, vector<1x1024xf32> -> vector<8x1024xf32>
    %4 = vector.extract_strided_slice %0 {offsets = [7, 0], sizes = [1, 1024], strides = [1, 1]} : vector<8x1024xf32> to vector<1x1024xf32>
    %5 = vector.extract_strided_slice %0 {offsets = [0, 0], sizes = [7, 1024], strides = [1, 1]} : vector<8x1024xf32> to vector<7x1024xf32>
    %6 = tpu.concatenate %4, %5 in 0 : vector<1x1024xf32>, vector<7x1024xf32> -> vector<8x1024xf32>
    %7 = tpu.iota {dimensions = array<i32: 0>} : vector<8x1xi32>
    %c2_i32 = arith.constant 2 : i32
    %c0_i32 = arith.constant 0 : i32
    %8 = arith.cmpi eq, %c2_i32, %c0_i32 : i32
    %c1_i32 = arith.constant 1 : i32
    %9 = arith.select %8, %c1_i32, %c2_i32 : i32
    %10 = vector.broadcast %9 : i32 to vector<8x1xi32>
    %11 = arith.remsi %7, %10 : vector<8x1xi32>
    %c0_i32_1 = arith.constant 0 : i32
    %12 = vector.broadcast %c0_i32_1 : i32 to vector<8x1xi32>
    %13 = arith.cmpi ne, %11, %12 : vector<8x1xi32>
    %c0_i32_2 = arith.constant 0 : i32
    %14 = vector.broadcast %c0_i32_2 : i32 to vector<8x1xi32>
    %15 = arith.cmpi slt, %11, %14 : vector<8x1xi32>
    %c0_i32_3 = arith.constant 0 : i32
    %16 = arith.cmpi slt, %9, %c0_i32_3 : i32
    %17 = vector.broadcast %16 : i1 to vector<8x1xi1>
    %18 = vector.broadcast %17 : vector<8x1xi1> to vector<8x1xi1>
    %19 = arith.xori %15, %18 : vector<8x1xi1>
    %20 = arith.andi %19, %13 : vector<8x1xi1>
    %21 = vector.broadcast %9 : i32 to vector<8x1xi32>
    %22 = arith.addi %11, %21 : vector<8x1xi32>
    %23 = arith.select %20, %22, %11 : vector<8x1xi1>, vector<8x1xi32>
    %c0_i32_4 = arith.constant 0 : i32
    %24 = vector.broadcast %c0_i32_4 : i32 to vector<8x1xi32>
    %25 = arith.cmpi eq, %23, %24 : vector<8x1xi32>
    %26 = vector.shape_cast %25 : vector<8x1xi1> to vector<8x1xi1>
    %27 = vector.broadcast %26 : vector<8x1xi1> to vector<8x1024xi1>
    %28 = arith.select %27, %3, %6 : vector<8x1024xi1>, vector<8x1024xf32>
    %c0_5 = arith.constant 0 : index
    %c0_6 = arith.constant 0 : index
    %29 = vector.load %arg2[%c0_5, %c0_6] : memref<8x1xf32, #tpu.memory_space<vmem>>, vector<8x1xf32>
    %30 = vector.broadcast %29 : vector<8x1xf32> to vector<8x1024xf32>
    %31 = arith.mulf %30, %0 : vector<8x1024xf32>
    %c0_7 = arith.constant 0 : index
    %c0_8 = arith.constant 0 : index
    %32 = vector.load %arg3[%c0_7, %c0_8] : memref<8x1xf32, #tpu.memory_space<vmem>>, vector<8x1xf32>
    %33 = vector.broadcast %32 : vector<8x1xf32> to vector<8x1024xf32>
    %34 = arith.mulf %33, %28 : vector<8x1024xf32>
    %35 = arith.addf %31, %34 : vector<8x1024xf32>
    %c0_9 = arith.constant 0 : index
    %c0_10 = arith.constant 0 : index
    %36 = vector.load %arg5[%c0_9, %c0_10] : memref<8x1024xf32, #tpu.memory_space<vmem>>, vector<8x1024xf32>
    tpu.vector_store %arg5[%c0_9, %c0_10], %35 {strides = array<i32>} : memref<8x1024xf32, #tpu.memory_space<vmem>>, vector<8x1024xf32>,
    return
  }
  func.func @transform_0(%arg0: i32, %arg1: i32) -> (i32, i32) {
    %c0_i32 = arith.constant 0 : i32
    %c0_i32_0 = arith.constant 0 : i32
    return %arg0, %c0_i32 : i32, i32
  }
  func.func @transform_1(%arg0: i32, %arg1: i32) -> (i32, i32) {
    %c0_i32 = arith.constant 0 : i32
    %c0_i32_0 = arith.constant 0 : i32
    return %arg0, %c0_i32 : i32, i32
  }
  func.func @transform_2(%arg0: i32, %arg1: i32) -> (i32, i32) {
    %c0_i32 = arith.constant 0 : i32
    return %arg0, %arg1 : i32, i32
  }
  func.func @transform_3(%arg0: i32, %arg1: i32) -> (i32, i32) {
    %c0_i32 = arith.constant 0 : i32
    return %arg0, %arg1 : i32, i32
  }
}

</mosaic_0001>

<bundles_post_ra>
// kernel: tpu_custom_call.1
= control target key start
LH: loop header
LB: loop body
LE: loop exit
PB: predicated region body
PF: predicated region fallthrough
CT: control target
= control target key end

     0   :  { %8 = vsyncpa [#allocation3], 0  ;;  %s302_s0 = inlined_call_operand.vmem [shape: f32[8,1], index: 0, kind: input, shape index: {}]   ;;  %s303_s1 = inlined_call_operand.vmem [shape: f32[8,1], index: 1, kind: input, shape index: {}]   ;;  %s304_s2 = inlined_call_operand.hbm [shape: f32[8,1024], index: 2, kind: input, shape index: {}]   ;;  %s305_s3 = inlined_call_operand.hbm [shape: f32[8,1024], index: 3, kind: output, shape index: {}]  }
   0x1   :  { %9 = vsyncpa [#allocation4], 0  ;;  %s229_s12 = smov [#allocation2]   ;;  %s181_s16 = scalar_lea.hbm %s304_s2, 1024 }
   0x2   :  { %s20_s13 = sshll.u32 %s229_s12, 4  ;;  %p182_p0 = scmp.ne.s32.totalorder %s304_s2, %s181_s16  ;;  %s21_s13 = int_to_ptr.vmem [resolvable:$true] %s20_s13 }
   0x3   :  { %p185_p1 = scmp.lt.u32.totalorder %s181_s16, %s304_s2 }
   0x5   :  { %p187_p2 = pnand %p185_p1, %p182_p0 }
   0x7   :  { %190 = shalt.err (!%p187_p2)
}
   0x8   :  { %s191_s21 = scalar_lea.vmem %s21_s13, 1024  ;;  %p196_p4 = scmp.lt.s32.totalorder %s21_s13, %s21_s13 }
   0x9   :  { %p192_p3 = scmp.ne.s32.totalorder %s21_s13, %s191_s21  ;;  %p197_p5 = scmp.lt.s32.totalorder %s191_s21, %s191_s21 }
   0xb   :  { %p198_p6 = por %p197_p5, %p196_p4 }
   0xd   :  { %p199_p7 = pnand %p198_p6, %p192_p3 }
   0xf   :  { %202 = shalt.err (!%p199_p7)
}
  0x10   :  { %23 = dma.hbm_to_vmem [thread:$0]  %s304_s2, 1024, %s21_s13, [#allocation3]  }
  0x11   :  { %225 = dma.done.wait [#allocation3], 1024  }
  0x12   :  { %226 = vsyncadd [#allocation3], 4294966272  ;;  %v230_v0 = vmov 0   ;;  %v118_v1 = vld [vmem:[%s302_s0] sm:$0xff]  ;;  %v93_v3 = vlaneseq  ;;  %v28_v7 = vld [vmem:[#allocation2 + $0x8] sm:$0xff]  ;;  %s231_s0 = smov [#allocation5]  }
  0x13   :  { %180 = vset.pattern.permute.xlu0 %v230_v0  ;;  %v132_v2 = vld [vmem:[%s303_s1] sm:$0xff]  ;;  %v29_v8 = vld [vmem:[#allocation2 + $0x10] sm:$0xff]  ;;  %v30_v9 = vld [vmem:[#allocation2 + $0x18] sm:$0xff]  ;;  %v44_v16 = vrot.slane %v28_v7, 1  ;;  %v69_v24 = vrot.slane %v28_v7, 7  ;;  %s168_s1 = sshll.u32 %s231_s0, 4  ;;  %s169_s1 = int_to_ptr.vmem [resolvable:$true] %s168_s1 }
  0x14   :  { %121 = vperm.xlu0 %180, %v118_v1   ;;  %v94_v4 = vshrl.u32 %v93_v3, 7  ;;  %v27_v6 = vld [vmem:[#allocation2] sm:$0xff]  ;;  %v32_v11 = vld [vmem:[#allocation2 + $0x28] sm:$0xff]  ;;  %v33_v12 = vld [vmem:[#allocation2 + $0x30] sm:$0xff]  ;;  %v45_v17 = vrot.slane %v29_v8, 1  ;;  %v46_v18 = vrot.slane %v30_v9, 1  ;;  %p208_p9 = scmp.lt.s32.totalorder %s169_s1, %s169_s1 }
  0x15   :  { %v31_v10 = vld [vmem:[#allocation2 + $0x20] sm:$0xff]  ;;  %v34_v13 = vld [vmem:[#allocation2 + $0x38] sm:$0xff]  ;;  %v43_v14 = vrot.slane %v27_v6, 1  ;;  %v48_v20 = vrot.slane %v32_v11, 1  ;;  %v49_v21 = vrot.slane %v33_v12, 1  ;;  %v68_v23 = vrot.slane %v27_v6, 7 }
  0x16   :  { %v99_v5 = vand.u32 1, %v94_v4  ;;  %v47_v19 = vrot.slane %v31_v10, 1  ;;  %v50_v22 = vrot.slane %v34_v13, 1  ;;  %v70_v25 = vrot.slane %v29_v8, 7  ;;  %s203_s2 = scalar_lea.vmem %s169_s1, 1024 }
  0x17   :  { %v71_v26 = vrot.slane %v30_v9, 7  ;;  %v72_v27 = vrot.slane %v31_v10, 7  ;;  %v73_v28 = vrot.slane %v32_v11, 7  ;;  %v74_v29 = vrot.slane %v33_v12, 7  ;;  %p204_p8 = scmp.ne.s32.totalorder %s169_s1, %s203_s2  ;;  %p209_p10 = scmp.lt.s32.totalorder %s203_s2, %s203_s2 }
  0x18   :  { %135 = vperm.xlu0 %180, %v132_v2   ;;  %vm270_vm0 = vcmp.eq.s32.totalorder %v99_v5, 0  ;;  %v75_v30 = vrot.slane %v34_v13, 7 }
  0x19   :  { %v110_v32 = vsel %vm270_vm0, %v43_v14, %v68_v23  ;;  %v111_v33 = vsel %vm270_vm0, %v44_v16, %v69_v24  ;;  %v112_v34 = vsel %vm270_vm0, %v45_v17, %v70_v25  ;;  %v113_v35 = vsel %vm270_vm0, %v46_v18, %v71_v26  ;;  %p210_p11 = por %p209_p10, %p208_p9 }
  0x1a   :  { %v114_v36 = vsel %vm270_vm0, %v47_v19, %v72_v27  ;;  %v115_v37 = vsel %vm270_vm0, %v48_v20, %v73_v28  ;;  %v116_v38 = vsel %vm270_vm0, %v49_v21, %v74_v29  ;;  %v117_v39 = vsel %vm270_vm0, %v50_v22, %v75_v30 }
  0x1b   :  { %p211_p12 = pnand %p210_p11, %p204_p8 }
  0x93   :  { %v122_v31 = vpop.permute.xlu0 %121 }
  0x94   :  { %v124_v40 = vmul.f32 %v122_v31, %v27_v6  ;;  %v125_v41 = vmul.f32 %v122_v31, %v28_v7  ;;  %v126_v42 = vmul.f32 %v122_v31, %v29_v8  ;;  %v127_v43 = vmul.f32 %v122_v31, %v30_v9 }
  0x95   :  { %v128_v45 = vmul.f32 %v122_v31, %v31_v10  ;;  %v129_v46 = vmul.f32 %v122_v31, %v32_v11  ;;  %v130_v47 = vmul.f32 %v122_v31, %v33_v12  ;;  %v131_v48 = vmul.f32 %v122_v31, %v34_v13 }
  0x97   :  { %v136_v44 = vpop.permute.xlu0 %135 }
  0x98   :  { %v138_v49 = vmul.f32 %v136_v44, %v110_v32  ;;  %v139_v50 = vmul.f32 %v136_v44, %v111_v33  ;;  %v140_v51 = vmul.f32 %v136_v44, %v112_v34  ;;  %v141_v52 = vmul.f32 %v136_v44, %v113_v35 }
  0x99   :  { %v142_v53 = vmul.f32 %v136_v44, %v114_v36  ;;  %v143_v54 = vmul.f32 %v136_v44, %v115_v37  ;;  %v144_v55 = vmul.f32 %v136_v44, %v116_v38  ;;  %v145_v56 = vmul.f32 %v136_v44, %v117_v39 }
  0x9a   :  { %v146_v57 = vadd.f32 %v138_v49, %v124_v40  ;;  %v147_v58 = vadd.f32 %v139_v50, %v125_v41  ;;  %v148_v59 = vadd.f32 %v140_v51, %v126_v42  ;;  %v149_v60 = vadd.f32 %v141_v52, %v127_v43 }
  0x9b   :  { %v150_v61 = vadd.f32 %v142_v53, %v128_v45  ;;  %v151_v62 = vadd.f32 %v143_v54, %v129_v46  ;;  %v152_v63 = vadd.f32 %v144_v55, %v130_v47  ;;  %v153_v0 = vadd.f32 %v145_v56, %v131_v48 }
  0x9c   :  { %154 = vst [vmem:[#allocation5] sm:$0xff] %v146_v57  ;;  %155 = vst [vmem:[#allocation5 + $0x8] sm:$0xff] %v147_v58 }
  0x9d   :  { %156 = vst [vmem:[#allocation5 + $0x10] sm:$0xff] %v148_v59  ;;  %157 = vst [vmem:[#allocation5 + $0x18] sm:$0xff] %v149_v60 }
  0x9e   :  { %158 = vst [vmem:[#allocation5 + $0x20] sm:$0xff] %v150_v61  ;;  %159 = vst [vmem:[#allocation5 + $0x28] sm:$0xff] %v151_v62 }
  0x9f   :  { %160 = vst [vmem:[#allocation5 + $0x30] sm:$0xff] %v152_v63  ;;  %161 = vst [vmem:[#allocation5 + $0x38] sm:$0xff] %v153_v0 }
  0xa0   :  { %214 = shalt.err (!%p211_p12)
}
  0xa1   :  { %s215_s30 = scalar_lea.hbm %s305_s3, 1024 }
  0xa2   :  { %p216_p13 = scmp.ne.s32.totalorder %s305_s3, %s215_s30  ;;  %p219_p0 = scmp.lt.u32.totalorder %s215_s30, %s305_s3 }
  0xa4   :  { %p221_p1 = pnand %p219_p0, %p216_p13 }
  0xa6   :  { %224 = shalt.err (!%p221_p1)
}
  0xa7   :  { %171 = dma.vmem_to_hbm [thread:$0]  %s169_s1, 1024, %s305_s3, [#allocation4]  }
  0xa8   :  { %227 = dma.done.wait [#allocation4], 1024  }
  0xa9   :  { %228 = vsyncadd [#allocation4], 4294966272 }
  0xaa   :  { %175 = vsyncpa [#allocation3], 1 }
  0xab   :  { %176 = vsyncpa [#allocation4], 1 }

</bundles_post_ra>
